<compile_context>
chip_gen: v7x
topology: tpu7x:2x2x1
jax: 0.10.0
libtpu: 0.0.40
codegen_flags: <defaults>
</compile_context>

<pallas_src>
import functools
import math

import jax
import jax.numpy as jnp
import numpy as np
from jax.experimental import pallas as pl
from jax.experimental.pallas import tpu as pltpu


# --------------------------------------------------------------------------
# VMEM-budgeted, dtype-aware row-tile selection
# --------------------------------------------------------------------------
_VMEM_TILE_BUDGET = 24 * 1024 * 1024   # double-buffered working-set budget
_VMEM_HEADROOM = 8 * 1024 * 1024       # compiler internal scratch headroom
_VMEM_LIMIT_CAP = 48 * 1024 * 1024     # stays under v7x's 64 MiB physical VMEM


def _sublane_granularity(dtype):
    itemsize = jnp.dtype(dtype).itemsize
    return {4: 8, 2: 16, 1: 32}.get(itemsize, 8)


def _pick_row_tile(n_rows, lane_width, dtype, *,
                   budget_bytes=_VMEM_TILE_BUDGET, max_tile=1024):
    """Largest row tile (multiple of the dtype's sublane granularity) whose
    double-buffered streaming working set fits `budget_bytes`.

    The grid uses pl.cdiv(n_rows, rt); a ragged last block is masked by
    Pallas (rows are independent here), so there is no full-extent fallback.
    """
    gran = _sublane_granularity(dtype)
    if n_rows <= gran:
        return n_rows                              # full extent is always legal
    itemsize = jnp.dtype(dtype).itemsize
    lane = max(lane_width, 128)                    # lanes are padded to 128 anyway
    # (1 input + 1 output) * 2 buffers (double-buffering) * rt * lane * itemsize
    per_row_bytes = 4 * lane * itemsize
    rt = budget_bytes // per_row_bytes
    rt = min(rt, max_tile, n_rows)
    # Keep >= 2 grid steps when possible (v7x megacore shares 'parallel' axes).
    rt = min(rt, max(gran, pl.cdiv(n_rows, 2)))
    rt = max(gran, (rt // gran) * gran)
    return int(rt)


def _vmem_limit(working_set_bytes):
    return int(min(max(working_set_bytes + _VMEM_HEADROOM, 16 * 1024 * 1024),
                   _VMEM_LIMIT_CAP))


# --------------------------------------------------------------------------
# Kernel 1: LayerNorm (torch semantics: unbiased std, eps added to std)
# --------------------------------------------------------------------------
def _layernorm_kernel(x_ref, g_ref, b_ref, o_ref, *, eps):
    x = x_ref[...].astype(jnp.float32)                     # (rt, D)
    d = x.shape[-1]
    mean = jnp.mean(x, axis=-1, keepdims=True)              # (rt, 1)
    xc = x - mean
    # torch.Tensor.std defaults to unbiased=True -> divide by (D - 1)
    var = jnp.sum(xc * xc, axis=-1, keepdims=True) / (d - 1)
    std = jnp.sqrt(var)
    # One reciprocal per row on the (rt, 1) column + a broadcast multiply,
    # instead of rt*D per-element divides.  approx=False keeps 1e-5 tolerance.
    inv = pl.reciprocal(std + eps, approx=False)            # (rt, 1)
    y = g_ref[...] * (xc * inv) + b_ref[...]                # broadcast (1, D)
    o_ref[...] = y.astype(o_ref.dtype)


def layernorm_pallas(x, gamma, beta, *, eps=1e-6):
    # TODO(synk): for D < 128 / D % 128 != 0 the output stores are masked
    # (partial lanes); production transformer widths (multiples of 128) are
    # lane-dense already.
    orig_shape = x.shape
    d = orig_shape[-1]
    n = int(np.prod(orig_shape[:-1]))
    x2 = x.reshape(n, d)
    g2 = gamma.reshape(1, d).astype(jnp.float32)
    b2 = beta.reshape(1, d).astype(jnp.float32)

    rt = _pick_row_tile(n, d, x.dtype)
    grid = (pl.cdiv(n, rt),)

    itemsize = jnp.dtype(x.dtype).itemsize
    lane = max(d, 128)
    working = 4 * rt * lane * itemsize + 4 * 4 * lane       # x/out dbl-buffered + gamma/beta

    out = pl.pallas_call(
        functools.partial(_layernorm_kernel, eps=eps),
        out_shape=jax.ShapeDtypeStruct((n, d), x.dtype),
        grid=grid,
        in_specs=[
            pl.BlockSpec((rt, d), lambda i: (i, 0)),
            pl.BlockSpec((1, d), lambda i: (0, 0)),
            pl.BlockSpec((1, d), lambda i: (0, 0)),
        ],
        out_specs=pl.BlockSpec((rt, d), lambda i: (i, 0)),
        compiler_params=pltpu.CompilerParams(
            dimension_semantics=("parallel",),
            vmem_limit_bytes=_vmem_limit(working)),
    )(x2, g2, b2)
    return out.reshape(orig_shape)


# --------------------------------------------------------------------------
# Kernel 2 (fused fast path): LN -> linear -> +bias -> +residual in ONE kernel
# --------------------------------------------------------------------------
def _fused_ln_linear_residual_kernel(x_ref, w_ref, bias_ref, g_ref, b_ref,
                                     o_ref, *, eps):
    x = x_ref[...].astype(jnp.float32)                      # (rt, D)
    d = x.shape[-1]
    mean = jnp.mean(x, axis=-1, keepdims=True)
    xc = x - mean
    var = jnp.sum(xc * xc, axis=-1, keepdims=True) / (d - 1)
    inv = pl.reciprocal(jnp.sqrt(var) + eps, approx=False)   # (rt, 1)
    normed = g_ref[...] * (xc * inv) + b_ref[...]            # LN prologue (VPU)
    y = jnp.dot(normed.astype(w_ref.dtype), w_ref[...],      # MXU
                preferred_element_type=jnp.float32)
    y = y + bias_ref[...]
    o_ref[...] = (x + y).astype(o_ref.dtype)                 # residual epilogue


def sublayer_connection_forward_fused_linear(x, W, bias, gamma, beta, *,
                                             eps=1e-6, dropout_p=0.1):
    """Fused path when sub_layer is a known linear projection h @ W + bias.

    One Pallas kernel: LayerNorm prologue, MXU matmul, +bias, +residual
    epilogue.  Removes two full activation round trips through HBM relative
    to the general path.  Requires W square (residual add needs matching
    shapes, as in the module).
    """
    del dropout_p  # identity in eval mode; see TODO(synk) at top of file
    orig_shape = x.shape
    d = orig_shape[-1]
    e = W.shape[-1]
    assert W.shape == (d, e) and e == d, "residual add requires square projection"
    n = int(np.prod(orig_shape[:-1]))
    x2 = x.reshape(n, d)
    g2 = gamma.reshape(1, d).astype(jnp.float32)
    b2 = beta.reshape(1, d).astype(jnp.float32)
    bias2 = bias.reshape(1, e).astype(jnp.float32)

    # W / bias / gamma / beta stay VMEM-resident across grid steps; budget the
    # streaming row tiles around them.
    # TODO(synk): for very large D the (rt, D) full-row block + resident W may
    # exceed VMEM; a K-tiled variant with precomputed LN stats would be needed.
    w_bytes = d * e * jnp.dtype(W.dtype).itemsize
    budget = max(_VMEM_TILE_BUDGET - 2 * w_bytes, 4 * 1024 * 1024)
    rt = _pick_row_tile(n, max(d, e), x.dtype, budget_bytes=budget)
    grid = (pl.cdiv(n, rt),)

    itemsize = jnp.dtype(x.dtype).itemsize
    lane = max(max(d, e), 128)
    working = 4 * rt * lane * itemsize + 2 * w_bytes + 6 * 4 * lane

    out = pl.pallas_call(
        functools.partial(_fused_ln_linear_residual_kernel, eps=eps),
        out_shape=jax.ShapeDtypeStruct((n, e), x.dtype),
        grid=grid,
        in_specs=[
            pl.BlockSpec((rt, d), lambda i: (i, 0)),    # x: LN input + residual
            pl.BlockSpec((d, e), lambda i: (0, 0)),     # W (VMEM-resident)
            pl.BlockSpec((1, e), lambda i: (0, 0)),     # bias
            pl.BlockSpec((1, d), lambda i: (0, 0)),     # gamma
            pl.BlockSpec((1, d), lambda i: (0, 0)),     # beta
        ],
        out_specs=pl.BlockSpec((rt, e), lambda i: (i, 0)),
        compiler_params=pltpu.CompilerParams(
            dimension_semantics=("parallel",),
            vmem_limit_bytes=_vmem_limit(working)),
    )(x2, W, bias2, g2, b2)
    return out.reshape(orig_shape[:-1] + (e,))


# --------------------------------------------------------------------------
# SubLayerConnections.forward (general path: arbitrary sub_layer callable)
# --------------------------------------------------------------------------
def sublayer_connection_forward(x, sub_layer, gamma, beta, *, eps=1e-6,
                                dropout_p=0.1):
    """x + dropout(sub_layer(LayerNorm(x))), dropout applied in eval mode.

    The residual add is intentionally NOT a separate Pallas kernel: a
    standalone pallas_call would be a fusion barrier forcing an extra full
    activation pass over HBM; leaving it to XLA lets it fuse into the
    sub_layer's epilogue.
    """
    del dropout_p  # identity in eval mode; see TODO(synk) at top of file
    normed = layernorm_pallas(x, gamma, beta, eps=eps)
    sub_out = sub_layer(normed)          # arbitrary user callable, plain JAX
    # Add in the promoted dtype, then cast back (avoids bf16 precision loss).
    acc_dtype = jnp.promote_types(x.dtype, sub_out.dtype)
    return (x.astype(acc_dtype) + sub_out.astype(acc_dtype)).astype(x.dtype)


if __name__ == "__main__":
    # Small shapes consistent with the module: batch=2, seq=8, hidden=32.
    B, S, D = 2, 8, 32
    EPS = 1e-6

    key = jax.random.PRNGKey(0)
    k_x, k_g, k_b, k_w, k_wb = jax.random.split(key, 5)

    x = jax.random.normal(k_x, (B, S, D), dtype=jnp.float32)
    # LayerNorm params (init is ones/zeros; use random values to exercise them)
    gamma = 1.0 + 0.1 * jax.random.normal(k_g, (D,), dtype=jnp.float32)
    beta = 0.1 * jax.random.normal(k_b, (D,), dtype=jnp.float32)

    # Example sub_layer: a simple linear projection (arbitrary JAX callable).
    W = jax.random.normal(k_w, (D, D), dtype=jnp.float32) / math.sqrt(D)
    wb = 0.1 * jax.random.normal(k_wb, (D,), dtype=jnp.float32)
    sub_layer = lambda h: jnp.einsum("bsd,de->bse", h, W) + wb

    # General path: Pallas LN -> plain-JAX sub_layer -> XLA-fused residual add.
    out_general = sublayer_connection_forward(x, sub_layer, gamma, beta, eps=EPS)
    out_general = jax.block_until_ready(out_general)

    # Fused path: single Pallas kernel (LN prologue + matmul + residual epilogue).
    out_fused = sublayer_connection_forward_fused_linear(x, W, wb, gamma, beta,
                                                         eps=EPS)
    out_fused = jax.block_until_ready(out_fused)

    # ---------------- reference (plain JAX, torch semantics) ----------------
    mean = jnp.mean(x, axis=-1, keepdims=True)
    std = jnp.std(x, axis=-1, keepdims=True, ddof=1)        # unbiased, like torch
    normed_ref = gamma * (x - mean) / (std + EPS) + beta
    ref = x + (jnp.einsum("bsd,de->bse", normed_ref, W) + wb)

    assert out_general.shape == (B, S, D)
    assert out_fused.shape == (B, S, D)
    np.testing.assert_allclose(np.asarray(out_general), np.asarray(ref),
                               rtol=1e-5, atol=1e-5)
    np.testing.assert_allclose(np.asarray(out_fused), np.asarray(ref),
                               rtol=1e-5, atol=1e-5)

    print("KERNEL_OK")
</pallas_src>

<mosaic_0001>
module attributes {stable_mosaic.version = 11 : i64} {
  func.func @_layernorm_kernel(%arg0: i32, %arg1: memref<8x32xf32, #tpu.memory_space<vmem>>, %arg2: memref<1x32xf32, #tpu.memory_space<vmem>>, %arg3: memref<1x32xf32, #tpu.memory_space<vmem>>, %arg4: memref<8x32xf32, #tpu.memory_space<vmem>>) attributes {dimension_semantics = [#tpu.dimension_semantics<parallel>], iteration_bounds = array<i64: 2>, scalar_prefetch = 0 : i64, scratch_operands = 0 : i64, tpu.core_type = #tpu.core_type<tc>, window_params = [{transform_indices = @transform_0, window_bounds = array<i64: 8, 32>}, {pipeline_mode = #tpu.pipeline_mode<synchronous>, transform_indices = @transform_1, window_bounds = array<i64: 1, 32>}, {pipeline_mode = #tpu.pipeline_mode<synchronous>, transform_indices = @transform_2, window_bounds = array<i64: 1, 32>}, {transform_indices = @transform_3, window_bounds = array<i64: 8, 32>}]} {
    %c0 = arith.constant 0 : index
    %c0_0 = arith.constant 0 : index
    %0 = vector.load %arg1[%c0, %c0_0] : memref<8x32xf32, #tpu.memory_space<vmem>>, vector<8x32xf32>
    %cst = arith.constant dense<0.000000e+00> : vector<8xf32>
    %1 = vector.multi_reduction <add>, %0, %cst [1] : vector<8x32xf32> to vector<8xf32>
    %2 = vector.shape_cast %1 : vector<8xf32> to vector<8x1xf32>
    %cst_1 = arith.constant 3.200000e+01 : f32
    %3 = vector.broadcast %cst_1 : f32 to vector<8x1xf32>
    %4 = arith.divf %2, %3 : vector<8x1xf32>
    %5 = vector.broadcast %4 : vector<8x1xf32> to vector<8x32xf32>
    %6 = arith.subf %0, %5 : vector<8x32xf32>
    %7 = arith.mulf %6, %6 : vector<8x32xf32>
    %cst_2 = arith.constant dense<0.000000e+00> : vector<8xf32>
    %8 = vector.multi_reduction <add>, %7, %cst_2 [1] : vector<8x32xf32> to vector<8xf32>
    %9 = vector.shape_cast %8 : vector<8xf32> to vector<8x1xf32>
    %cst_3 = arith.constant 3.100000e+01 : f32
    %10 = vector.broadcast %cst_3 : f32 to vector<8x1xf32>
    %11 = arith.divf %9, %10 : vector<8x1xf32>
    %12 = math.sqrt %11 : vector<8x1xf32>
    %cst_4 = arith.constant 9.99999997E-7 : f32
    %13 = vector.broadcast %cst_4 : f32 to vector<8x1xf32>
    %14 = arith.addf %12, %13 : vector<8x1xf32>
    %15 = tpu.reciprocal %14 : vector<8x1xf32> -> vector<8x1xf32>
    %c0_5 = arith.constant 0 : index
    %c0_6 = arith.constant 0 : index
    %16 = vector.load %arg2[%c0_5, %c0_6] : memref<1x32xf32, #tpu.memory_space<vmem>>, vector<1x32xf32>
    %17 = vector.broadcast %15 : vector<8x1xf32> to vector<8x32xf32>
    %18 = arith.mulf %6, %17 : vector<8x32xf32>
    %19 = vector.broadcast %16 : vector<1x32xf32> to vector<8x32xf32>
    %20 = arith.mulf %19, %18 : vector<8x32xf32>
    %c0_7 = arith.constant 0 : index
    %c0_8 = arith.constant 0 : index
    %21 = vector.load %arg3[%c0_7, %c0_8] : memref<1x32xf32, #tpu.memory_space<vmem>>, vector<1x32xf32>
    %22 = vector.broadcast %21 : vector<1x32xf32> to vector<8x32xf32>
    %23 = arith.addf %20, %22 : vector<8x32xf32>
    %c0_9 = arith.constant 0 : index
    %c0_10 = arith.constant 0 : index
    %24 = vector.load %arg4[%c0_9, %c0_10] : memref<8x32xf32, #tpu.memory_space<vmem>>, vector<8x32xf32>
    tpu.vector_store %arg4[%c0_9, %c0_10], %23 {strides = array<i32>} : memref<8x32xf32, #tpu.memory_space<vmem>>, vector<8x32xf32>,
    return
  }
  func.func @transform_0(%arg0: i32) -> (i32, i32) {
    %c0_i32 = arith.constant 0 : i32
    %c0_i32_0 = arith.constant 0 : i32
    return %arg0, %c0_i32 : i32, i32
  }
  func.func @transform_1(%arg0: i32) -> (i32, i32) {
    %c0_i32 = arith.constant 0 : i32
    %c0_i32_0 = arith.constant 0 : i32
    %c0_i32_1 = arith.constant 0 : i32
    return %c0_i32, %c0_i32_0 : i32, i32
  }
  func.func @transform_2(%arg0: i32) -> (i32, i32) {
    %c0_i32 = arith.constant 0 : i32
    %c0_i32_0 = arith.constant 0 : i32
    %c0_i32_1 = arith.constant 0 : i32
    return %c0_i32, %c0_i32_0 : i32, i32
  }
  func.func @transform_3(%arg0: i32) -> (i32, i32) {
    %c0_i32 = arith.constant 0 : i32
    %c0_i32_0 = arith.constant 0 : i32
    return %arg0, %c0_i32 : i32, i32
  }
}

</mosaic_0001>

<bundles_post_ra>
// kernel: tpu_custom_call.1
= control target key start
LH: loop header
LB: loop body
LE: loop exit
PB: predicated region body
PF: predicated region fallthrough
CT: control target
= control target key end

     0   :  { %8 = vsyncpa [#allocation3], 0  ;;  %s669_s0 = inlined_call_operand.hbm [shape: f32[16,32], index: 0, kind: input, shape index: {}]   ;;  %s670_s1 = inlined_call_operand.vmem [shape: f32[1,32], index: 1, kind: input, shape index: {}]   ;;  %s671_s2 = inlined_call_operand.vmem [shape: f32[1,32], index: 2, kind: input, shape index: {}]   ;;  %s672_s3 = inlined_call_operand.hbm [shape: f32[16,32], index: 3, kind: output, shape index: {}]  }
   0x1   :  { %10 = vsyncpa [#allocation3 + $0x1], 0 }
   0x2   :  { %11 = vsyncpa [#allocation4], 0 }
   0x3   :  { %13 = vsyncpa [#allocation4 + $0x1], 0  ;;  %s495_s12 = smov 0   ;;  %s497_s13 = smov 0  }
   0x4   :  { %s499_s14 = smov 0   ;;  %s501_s15 = smov 0  }
   0x5 LB: > { %s516_s16 = sadd.s32 4294967295, %s471_s15   ;;  %s311_s17 = sadd.s32 4294967294, %s471_s15   ;;  %s471_s15 = sphi %s501_s15, %s687_s15   ;;  %s467_s14 = sphi %s499_s14, %s686_s14   ;;  %s463_s13 = sphi %s497_s13, %s685_s13   ;;  %s459_s12 = sphi %s495_s12, %s684_s12  }
   0x6   : > { %s520_s18 = sadd.s32 1, %s471_s15   ;;  %s26_s19 = sadd.s32 1, %s467_s14 }
   0x7   : > { %s23_s20 = ssub.s32 %s471_s15, %s520_s18  ;;  %p33_p0 = scmp.ne.s32.totalorder %s467_s14, %s463_s13 }
   0x8   : > { %p24_p1 = scmp.eq.s32.totalorder %s23_s20, 0  ;;  %p34_p2 = scmp.eq.s32.totalorder %s471_s15, 0 }
   0x9   : > { %p39_p3 = scmp.ne.s32.totalorder %s463_s13, %s459_s12  ;;  %p40_p4 = scmp.eq.s32.totalorder %s516_s16, 0 }
   0xa   : > { %s532_s21 = scalar_select %p24_p1, %s467_s14, %s26_s19  }
   0xb   : > { %p534_p5 = por %p34_p2, %p33_p0  ;;  %p538_p6 = por %p40_p4, %p39_p3 }
   0xc   : > { %p105_p7 = scmp.eq.s32.totalorder %s516_s16, 1  ;;  %p111_p8 = scmp.eq.s32.totalorder %s311_s17, 1 }
   0xd   : > { %p337_p10 = scmp.lt.s32.totalorder %s471_s15, 2  ;;  %s137_s26 = sand.u32 1, %s467_s14  }
   0xe   : > { %p545_p11 = por %p105_p7, %p33_p0  ;;  %p549_p12 = por %p111_p8, %p39_p3 }
   0xf   : > { %s315_s27 = sshll.u32 %s471_s15, 7  ;;  %s314_s28 = sshll.u32 %s137_s26, 3 }
  0x10   : > { %s676_s24 = scalar_select %p545_p11, 1, 0 }
  0x11   : > { %s677_s25 = scalar_select %p549_p12, 1, 0 }
  0x12   : > { %s558_s4 = scalar_lea.hbm %s669_s0, %s315_s27  ;;  %s141_s5 = scalar_lea.vmem [#allocation2], %s314_s28 }
  0x13   : > { %s148_s6 = sshll.u32 %s141_s5, 4  ;;  %p562_p13 = pnand %p337_p10, %p534_p5  ;;  %s566_s6 = int_to_ptr.vmem [resolvable:$true] %s148_s6 }
  0x14   : > { %s138_s8 = scalar_lea.sflag [#allocation3], %s137_s26  ;;  %s375_s9 = scalar_lea.hbm %s558_s4, 128 }
  0x15   : > { %p376_p2 = scmp.ne.s32.totalorder %s558_s4, %s375_s9  ;;  %p377_p3 = pneg %p562_p13 }
  0x16   : > { %s380_s17 = scalar_lea.hbm %s669_s0, 256  ;;  %p381_p5 = scmp.lt.u32.totalorder %s558_s4, %s669_s0 }
  0x17   : > { %p378_p4 = pnand %p377_p3, %p376_p2  ;;  %p382_p8 = scmp.lt.u32.totalorder %s380_s17, %s375_s9 }
  0x18   : > { %p384_p9 = scmp.lt.u32.totalorder %s375_s9, %s558_s4 }
  0x19   : > { %p379_p7 = pneg %p378_p4  ;;  %p383_p10 = por %p382_p8, %p381_p5 }
  0x1b   : > { %p385_p0 = por %p384_p9, %p383_p10 }
  0x1d   : > { %p386_p1 = pnand %p385_p0, %p379_p7 }
  0x1f   : > { %389 = shalt.err (!%p386_p1)
}
  0x20   : > { %s390_s22 = scalar_lea.vmem %s566_s6, 128  ;;  %s473_s26 = smov [#allocation2]  }
  0x21   : > { %p391_p2 = scmp.ne.s32.totalorder %s566_s6, %s390_s22  ;;  %s395_s27 = sshll.u32 %s473_s26, 4  ;;  %s396_s27 = int_to_ptr.vmem [resolvable:$false] %s395_s27 }
  0x22   : > { %s397_s28 = scalar_lea.vmem %s396_s27, 256  ;;  %p398_p11 = scmp.lt.s32.totalorder %s566_s6, %s396_s27 }
  0x23   : > { %p393_p4 = pnand %p391_p2, %p377_p3  ;;  %p399_p5 = scmp.lt.s32.totalorder %s397_s28, %s390_s22 }
  0x25   : > { %p394_p12 = pneg %p393_p4  ;;  %p400_p8 = por %p399_p5, %p398_p11 }
  0x27   : > { %p401_p9 = pnand %p400_p8, %p394_p12 }
  0x29   : > { %404 = shalt.err (!%p401_p9)
}
  0x2a   : > { %332 = dma.hbm_to_vmem [thread:$0]  (!%p562_p13), %s558_s4, 128, %s566_s6, %s138_s8  }
  0x2b   : > { %p679_p0 = scmp.lt.s32.totalorder %s471_s15, 3  ;;  %p680_p1 = scmp.ge.s32.totalorder %s471_s15, 1 }
  0x2d   : > { %p154_p3 = pnand %p680_p1, %p679_p0 }
  0x2e   : > { %s600_s29 = sand.u32 (!%p154_p3), 1, %s463_s13  }
  0x2f   : > { %157 = sbr.rel (%p154_p3) target bundleno = 398 (0x18e), region = 32  ;;  %s317_s30 = sshll.u32 (!%p154_p3), %s600_s29, 3 }
  0x30   : > { %s160_s5 = scalar_lea.sflag (!%p154_p3), [#allocation3], %s600_s29  ;;  %s163_s7 = scalar_lea.vmem (!%p154_p3), [#allocation2], %s317_s30 }
  0x36   : > { %450 = dma.done.wait (%p538_p6), %s160_s5, 128  }
  0x37   : > { %452 = vsyncadd (%p538_p6), %s160_s5, 4294967168  ;;  %vm187_vm0 = vcmask 261120   ;;  %v186_v0 = vld [vmem:[%s163_s7] sm:$0xff]  ;;  %s322_s9 = sshll.u32 %s516_s16, 7  ;;  %s185_s10 = scalar_lea.vmem [#allocation5], %s317_s30 }
  0x38   : > { %v188_v1 = vsel %vm187_vm0, %v186_v0, 0.0  ;;  %v319_v16 = vld [vmem:[%s670_s1] ss:$0 sm:$0xff]  ;;  %s241_s11 = sshll.u32 %s185_s10, 4  ;;  %s624_s20 = scalar_lea.hbm %s672_s3, %s322_s9  ;;  %s626_s11 = int_to_ptr.vmem [resolvable:$true] %s241_s11 }
  0x39   : > { %189 = vadd.xlane.f32.xlu0 %v188_v1  ;;  %v320_v18 = vld [vmem:[%s671_s2] ss:$0 sm:$0xff]  ;;  %s228_s22 = scalar_lea.sflag [#allocation4], %s600_s29  ;;  %s405_s26 = scalar_lea.vmem %s626_s11, 128 }
  0x3a   : > { %p406_p6 = scmp.ne.s32.totalorder %s626_s11, %s405_s26  ;;  %p681_p11 = scmp.ne.s32.totalorder %s676_s24, 0 }
  0x3b   : > { %s474_s16 = smov [#allocation5]  }
  0x3c   : > { %p407_p12 = pnand %p406_p6, %p681_p11  ;;  %s409_s27 = sshll.u32 %s474_s16, 4  ;;  %s410_s27 = int_to_ptr.vmem [resolvable:$false] %s409_s27 }
  0x3d   : > { %s411_s28 = scalar_lea.vmem %s410_s27, 256  ;;  %p412_p7 = scmp.lt.s32.totalorder %s626_s11, %s410_s27 }
  0x3e   : > { %p408_p13 = pneg %p407_p12  ;;  %p413_p10 = scmp.lt.s32.totalorder %s411_s28, %s405_s26 }
  0x40   : > { %p414_p2 = por %p413_p10, %p412_p7 }
  0x42   : > { %p415_p4 = pnand %p414_p2, %p408_p13 }
  0xc6   : > { %v190_v2 = vpop.xlane.xlu0 %189 }
  0xc7   : > { %v192_v3 = vmul.f32 0.03125, %v190_v2 }
  0xc9   : > { %v193_v4 = vsub.f32 %v186_v0, %v192_v3 }
  0xcb   : > { %v194_v5 = vmul.f32 %v193_v4, %v193_v4 }
  0xcd   : > { %v195_v6 = vsel %vm187_vm0, %v194_v5, 0.0 }
  0xce   : > { %196 = vadd.xlane.f32.xlu0 %v195_v6 }
 0x15b   : > { %v197_v7 = vpop.xlane.xlu0 %196 }
 0x15c   : > { %v199_v8 = vmul.f32 0.032258064, %v197_v7 }
 0x15e   : > { %371 = vrsqrt.f32 %v199_v8  ;;  %vm202_vm1 = vcmp.eq.f32.partialorder %v199_v8, inf  ;;  %v205_v11 = vand.u32 2147483648, %v199_v8  ;;  %vm204_vm2 = vcmp.eq.f32.partialorder %v199_v8, 0.0 }
 0x168   : > { %v372_v9 = vpop.eup %371 }
 0x169   : > { %v201_v10 = vmul.f32 %v372_v9, %v199_v8 }
 0x16b   : > { %v203_v12 = vsel %vm202_vm1, %v199_v8, %v201_v10 }
 0x16c   : > { %v206_v13 = vsel %vm204_vm2, %v205_v11, %v203_v12 }
 0x16d   : > { %v207_v14 = vadd.f32 1e-06, %v206_v13 }
 0x16f   : > { %373 = vrcp.f32 %v207_v14 }
 0x179   : > { %v374_v15 = vpop.eup %373 }
 0x17a   : > { %v210_v17 = vmul.f32 %v374_v15, %v193_v4 }
 0x17c   : > { %v217_v19 = vmul.f32 %v319_v16, %v210_v17 }
 0x17e   : > { %v225_v20 = vadd.f32 %v320_v18, %v217_v19 }
 0x180   : > { %226 = vst.msk [vmem:[%s185_s10] sm:$0xff] %vm187_vm0, %v225_v20 }
 0x181   : > { %418 = shalt.err (!%p415_p4)
}
 0x182   : > { %s419_s29 = scalar_lea.hbm %s624_s20, 128  ;;  %s423_s7 = scalar_lea.hbm %s672_s3, 256 }
 0x183   : > { %p420_p5 = scmp.ne.s32.totalorder %s624_s20, %s419_s29  ;;  %p424_p0 = scmp.lt.u32.totalorder %s624_s20, %s672_s3 }
 0x184   : > { %p425_p1 = scmp.lt.u32.totalorder %s423_s7, %s419_s29  ;;  %p427_p6 = scmp.lt.u32.totalorder %s419_s29, %s624_s20 }
 0x185   : > { %p421_p8 = pnand %p420_p5, %p681_p11 }
 0x186   : > { %p426_p3 = por %p425_p1, %p424_p0 }
 0x187   : > { %p422_p9 = pneg %p421_p8 }
 0x188   : > { %p428_p12 = por %p427_p6, %p426_p3 }
 0x18a   : > { %p429_p13 = pnand %p428_p12, %p422_p9 }
 0x18c   : > { %432 = shalt.err (!%p429_p13)
}
 0x18d   : > { %327 = dma.vmem_to_hbm [thread:$0]  (%p681_p11), %s626_s11, 128, %s624_s20, %s228_s22  }
 0x18e PF: > { %s253_s6 = sand.u32 1, %s459_s12   ;;  %p682_p7 = scmp.ne.s32.totalorder %s677_s25, 0 }
 0x18f   : > { %p683_p10 = scmp.ge.s32.totalorder %s471_s15, 2  ;;  %s254_s8 = scalar_lea.sflag [#allocation4], %s253_s6 }
 0x191   : > { %p334_p2 = pnand %p683_p10, %p682_p7 }
 0x193   : > { %454 = dma.done.wait (!%p334_p2), %s254_s8, 128  }
 0x194   : > { %456 = vsyncadd (!%p334_p2), %s254_s8, 4294967168  ;;  %p16_p4 = scmp.ge.s32.totalorder %s520_s18, 4   ;;  %s684_s12 = smov %s463_s13 }
 0x195   : > { %s685_s13 = smov %s467_s14  ;;  %s686_s14 = smov %s532_s21 }
 0x196   : > { %s687_s15 = smov %s520_s18  ;;  %18 = sbr.rel (!%p16_p4) target bundleno = 5 (0x5), region = 77 }
 0x19d   :  { %259 = vsyncpa [#allocation3], 1 }
 0x19e   :  { %261 = vsyncpa [#allocation3 + $0x1], 1 }
 0x19f   :  { %262 = vsyncpa [#allocation4], 1 }
 0x1a0   :  { %264 = vsyncpa [#allocation4 + $0x1], 1 }

</bundles_post_ra>
